<compile_context>
chip_gen: v7x
topology: tpu7x:2x2x1
jax: 0.10.0
libtpu: 0.0.40
codegen_flags: <defaults>
</compile_context>

<pallas_src>
import functools

import jax
import jax.numpy as jnp
from jax import lax
from jax.experimental import pallas as pl
from jax.experimental.pallas import tpu as pltpu

_LANE = 128


def _round_up(x, m):
    return ((x + m - 1) // m) * m


def _cdiv(a, b):
    return (a + b - 1) // b


def _vmem_capacity_bytes():
    """Physical VMEM of the attached TPU generation (fallback: 64 MiB, v7x)."""
    try:
        return int(pltpu.get_tpu_info().vmem_capacity_bytes)
    except Exception:  # no TPU visible at trace time / interpret mode
        return 64 * 1024 * 1024


def _vmem_limit_bytes():
    return int(_vmem_capacity_bytes() * 0.8)


def _plan_k_tiling(m, k, feat_bytes, n_resident_gram_bufs, tk_cap=None):
    """Choose the K tile so that the double-buffered (m, tk) feature tile plus
    the resident (m, m) f32 Gram buffers fit this generation's VMEM.

    Returns (tk, nk, mask_tail).
    """
    usable = int(_vmem_capacity_bytes() * 0.6)      # headroom for compiler scratch
    fixed = n_resident_gram_bufs * m * m * 4        # resident f32 Gram buffers
    budget = max(usable - fixed, 2 * m * _LANE * feat_bytes)
    tk_max = budget // (2 * m * feat_bytes)         # 2 = input double buffering
    tk_max = max(_LANE, (tk_max // _LANE) * _LANE)
    if tk_cap is not None:                          # test hook
        tk_max = min(tk_max, max(_LANE, (tk_cap // _LANE) * _LANE))
    if k <= tk_max and tk_cap is None:
        # Single K step: block dim == full array dim is always layout-legal,
        # so no padding and no masking are needed.
        return k, 1, False
    if k <= tk_max:
        return k, 1, False
    # Balance tile size so K over-read is bounded by < 128 * nk elements.
    nk = _cdiv(k, tk_max)
    tk = _round_up(_cdiv(k, nk), _LANE)
    nk = _cdiv(k, tk)
    return tk, nk, (k % tk != 0)


# --------------------------------------------------------------------------
# Kernels
# --------------------------------------------------------------------------
def _feature_tile(feat_ref, kk, *, tk, k_total, mask_tail, to_bf16):
    """Load the current (m, tk) feature tile, zeroing the out-of-bounds K tail."""
    f = feat_ref[...]
    if mask_tail:
        col = kk * tk + lax.broadcasted_iota(jnp.int32, f.shape, 1)
        f = jnp.where(col < k_total, f, jnp.zeros_like(f))
    if to_bf16 and f.dtype != jnp.bfloat16:
        f = f.astype(jnp.bfloat16)
    return f


def _gram_kernel(feat_ref, gram_ref, *, inv_denom, tk, k_total, mask_tail,
                 to_bf16):
    """Accumulate F @ F^T over K tiles into the resident (m, m) output."""
    kk = pl.program_id(0)

    @pl.when(kk == 0)
    def _():
        gram_ref[...] = jnp.zeros_like(gram_ref)

    f = _feature_tile(feat_ref, kk, tk=tk, k_total=k_total,
                      mask_tail=mask_tail, to_bf16=to_bf16)
    gram_ref[...] += lax.dot_general(
        f, f,
        dimension_numbers=(((1,), (1,)), ((), ())),  # A . A^T, no transpose
        preferred_element_type=jnp.float32)

    @pl.when(kk == pl.num_programs(0) - 1)
    def _():
        gram_ref[...] = gram_ref[...] * inv_denom


def _style_loss_kernel(feat_ref, target_hbm, loss_ref, gram_acc, tgt_vmem,
                       tgt_sem, *, inv_denom, inv_count, tk, k_total,
                       mask_tail, to_bf16):
    """Gram accumulation over K tiles + MSE vs. the precomputed target Gram."""
    kk = pl.program_id(0)
    nk = pl.num_programs(0)

    @pl.when(kk == 0)
    def _():
        gram_acc[...] = jnp.zeros_like(gram_acc)
        # Single-buffered target fetch; overlapped with the whole K loop since
        # the target Gram is only consumed on the final step.
        pltpu.make_async_copy(target_hbm, tgt_vmem, tgt_sem).start()

    f = _feature_tile(feat_ref, kk, tk=tk, k_total=k_total,
                      mask_tail=mask_tail, to_bf16=to_bf16)
    gram_acc[...] += lax.dot_general(
        f, f,
        dimension_numbers=(((1,), (1,)), ((), ())),
        preferred_element_type=jnp.float32)

    @pl.when(kk == nk - 1)
    def _():
        pltpu.make_async_copy(target_hbm, tgt_vmem, tgt_sem).wait()
        g = gram_acc[...] * inv_denom
        diff = g - tgt_vmem[...]
        loss_ref[0, 0] = jnp.sum(diff * diff) * inv_count


# --------------------------------------------------------------------------
# Wrappers
# --------------------------------------------------------------------------
def gram_matrix(x, *, bf16_features=False, _tk_cap=None):
    """Normalized Gram matrix of an NCHW tensor; true (M, M) output."""
    n, c, h, w = x.shape
    m, k = n * c, h * w
    feats = x.reshape(m, k)                       # free reshape, no HBM pad copy
    feat_bytes = jnp.dtype(x.dtype).itemsize
    # Resident f32 buffers: the (m, m) output is (double-)buffered by Pallas.
    tk, nk, mask_tail = _plan_k_tiling(m, k, feat_bytes,
                                       n_resident_gram_bufs=2, tk_cap=_tk_cap)
    inv_denom = 1.0 / float(m * k)                # = 1 / (n*c*h*w)
    cost = pl.CostEstimate(
        flops=2 * m * m * nk * tk,
        transcendentals=0,
        bytes_accessed=m * k * feat_bytes + m * m * 4)
    return pl.pallas_call(
        functools.partial(_gram_kernel, inv_denom=inv_denom, tk=tk, k_total=k,
                          mask_tail=mask_tail, to_bf16=bf16_features),
        out_shape=jax.ShapeDtypeStruct((m, m), jnp.float32),
        grid_spec=pltpu.PrefetchScalarGridSpec(
            num_scalar_prefetch=0,
            grid=(nk,),
            in_specs=[pl.BlockSpec((m, tk), lambda kk: (0, kk))],
            out_specs=pl.BlockSpec((m, m), lambda kk: (0, 0)),
        ),
        compiler_params=pltpu.CompilerParams(
            dimension_semantics=("arbitrary",),
            vmem_limit_bytes=_vmem_limit_bytes()),
        cost_estimate=cost,
    )(feats)


class StyleLoss:
    """JAX/Pallas port of the PyTorch StyleLoss module."""

    def __init__(self, target_feature, *, bf16_features=False):
        self._bf16 = bf16_features
        # Target Gram is a detached constant of true shape (M, M).
        self._target = lax.stop_gradient(
            gram_matrix(target_feature, bf16_features=bf16_features))
        self.loss = None

    def __call__(self, x):
        n, c, h, w = x.shape
        m, k = n * c, h * w
        assert self._target.shape == (m, m), "input/target channel mismatch"
        feats = x.reshape(m, k)
        feat_bytes = jnp.dtype(x.dtype).itemsize
        # Resident f32 buffers: Gram accumulator + single-buffered target copy.
        tk, nk, mask_tail = _plan_k_tiling(m, k, feat_bytes,
                                           n_resident_gram_bufs=2)
        inv_denom = 1.0 / float(m * k)
        inv_count = 1.0 / float(m * m)            # MSE mean over the M x M Gram
        cost = pl.CostEstimate(
            flops=2 * m * m * nk * tk,
            transcendentals=0,
            bytes_accessed=m * k * feat_bytes + m * m * 4 + 4)
        loss = pl.pallas_call(
            functools.partial(_style_loss_kernel, inv_denom=inv_denom,
                              inv_count=inv_count, tk=tk, k_total=k,
                              mask_tail=mask_tail, to_bf16=self._bf16),
            out_shape=jax.ShapeDtypeStruct((1, 1), jnp.float32),
            grid_spec=pltpu.PrefetchScalarGridSpec(
                num_scalar_prefetch=0,
                grid=(nk,),
                in_specs=[
                    pl.BlockSpec((m, tk), lambda kk: (0, kk)),
                    pl.BlockSpec(memory_space=pl.ANY),   # target stays in HBM
                ],
                # Only the scalar loss leaves the chip; Gram stays in VMEM.
                out_specs=pl.BlockSpec(memory_space=pltpu.MemorySpace.SMEM),
                scratch_shapes=[
                    pltpu.VMEM((m, m), jnp.float32),     # Gram accumulator
                    pltpu.VMEM((m, m), jnp.float32),     # target Gram (1 buffer)
                    pltpu.SemaphoreType.DMA(()),
                ],
            ),
            compiler_params=pltpu.CompilerParams(
                dimension_semantics=("arbitrary",),
                vmem_limit_bytes=_vmem_limit_bytes()),
            cost_estimate=cost,
        )(feats, self._target)
        self.loss = loss[0, 0]
        return x  # forward returns the input unchanged


def _reference_gram(t):
    n, c, h, w = t.shape
    f = t.reshape(n * c, h * w).astype(jnp.float32)
    return (f @ f.T) / float(n * c * h * w)


if __name__ == "__main__":
    key = jax.random.PRNGKey(0)
    k_target, k_input = jax.random.split(key)

    # Small shapes consistent with a conv feature map: N=2, C=4, H=W=16.
    target_feature = jax.random.normal(k_target, (2, 4, 16, 16), dtype=jnp.float32)
    x = jax.random.normal(k_input, (2, 4, 16, 16), dtype=jnp.float32)

    module = StyleLoss(target_feature)
    out = module(x)
    out = jax.block_until_ready(out)
    loss = jax.block_until_ready(module.loss)

    # Output passthrough + loss matches pure-JAX reference.
    assert out.shape == x.shape and bool(jnp.allclose(out, x))
    ref_loss = jnp.mean((_reference_gram(x) - _reference_gram(target_feature)) ** 2)
    assert bool(jnp.allclose(loss, ref_loss, rtol=1e-5, atol=1e-6)), (loss, ref_loss)

    # Standalone Gram kernel (single K tile, no masking).
    g = jax.block_until_ready(gram_matrix(x))
    assert bool(jnp.allclose(g, _reference_gram(x), rtol=1e-5, atol=1e-6))

    # Exercise the K-tiled + tail-masked path (K=300 not a multiple of 128).
    x2 = jax.random.normal(k_input, (1, 8, 12, 25), dtype=jnp.float32)
    g2 = jax.block_until_ready(gram_matrix(x2, _tk_cap=128))
    assert bool(jnp.allclose(g2, _reference_gram(x2), rtol=1e-5, atol=1e-6))

    print("KERNEL_OK")
</pallas_src>

<mosaic_0001>
module attributes {stable_mosaic.version = 11 : i64} {
  func.func @_gram_kernel(%arg0: i32, %arg1: memref<8x256xf32, #tpu.memory_space<vmem>>, %arg2: memref<8x8xf32, #tpu.memory_space<vmem>>) attributes {dimension_semantics = [#tpu.dimension_semantics<arbitrary>], iteration_bounds = array<i64: 1>, scalar_prefetch = 0 : i64, scratch_operands = 0 : i64, tpu.core_type = #tpu.core_type<tc>, window_params = [{transform_indices = @transform_0, window_bounds = array<i64: 8, 256>}, {pipeline_mode = #tpu.pipeline_mode<synchronous>, transform_indices = @transform_1, window_bounds = array<i64: 8, 8>}]} {
    %c0_i32 = arith.constant 0 : i32
    %0 = arith.cmpi eq, %arg0, %c0_i32 : i32
    %1 = arith.extui %0 : i1 to i32
    %c0_i32_0 = arith.constant 0 : i32
    %2 = arith.cmpi ne, %1, %c0_i32_0 : i32
    scf.if %2 {
      %cst_8 = arith.constant 0.000000e+00 : f32
      %11 = vector.broadcast %cst_8 : f32 to vector<8x8xf32>
      %c0_9 = arith.constant 0 : index
      %c0_10 = arith.constant 0 : index
      %12 = vector.load %arg2[%c0_9, %c0_10] : memref<8x8xf32, #tpu.memory_space<vmem>>, vector<8x8xf32>
      tpu.vector_store %arg2[%c0_9, %c0_10], %11 {strides = array<i32>} : memref<8x8xf32, #tpu.memory_space<vmem>>, vector<8x8xf32>,
    } else {
    }
    %c0 = arith.constant 0 : index
    %c0_1 = arith.constant 0 : index
    %3 = vector.load %arg1[%c0, %c0_1] : memref<8x256xf32, #tpu.memory_space<vmem>>, vector<8x256xf32>
    %c0_2 = arith.constant 0 : index
    %c0_3 = arith.constant 0 : index
    %4 = vector.load %arg2[%c0_2, %c0_3] : memref<8x8xf32, #tpu.memory_space<vmem>>, vector<8x8xf32>
    %cst = arith.constant dense<0.000000e+00> : vector<8x8xf32>
    %5 = tpu.matmul %3, %3, %cst {dimension_numbers = #tpu.dot_dimension_numbers<[1], [1], [0], [0], [0, 0, 1, 0], [], []>} : vector<8x256xf32>, vector<8x256xf32>, vector<8x8xf32> -> vector<8x8xf32>
    %6 = arith.addf %4, %5 : vector<8x8xf32>
    %c0_4 = arith.constant 0 : index
    %c0_5 = arith.constant 0 : index
    %7 = vector.load %arg2[%c0_4, %c0_5] : memref<8x8xf32, #tpu.memory_space<vmem>>, vector<8x8xf32>
    tpu.vector_store %arg2[%c0_4, %c0_5], %6 {strides = array<i32>} : memref<8x8xf32, #tpu.memory_space<vmem>>, vector<8x8xf32>,
    %c0_i32_6 = arith.constant 0 : i32
    %8 = arith.cmpi eq, %arg0, %c0_i32_6 : i32
    %9 = arith.extui %8 : i1 to i32
    %c0_i32_7 = arith.constant 0 : i32
    %10 = arith.cmpi ne, %9, %c0_i32_7 : i32
    scf.if %10 {
      %c0_8 = arith.constant 0 : index
      %c0_9 = arith.constant 0 : index
      %11 = vector.load %arg2[%c0_8, %c0_9] : memref<8x8xf32, #tpu.memory_space<vmem>>, vector<8x8xf32>
      %cst_10 = arith.constant 4.8828125E-4 : f32
      %12 = vector.broadcast %cst_10 : f32 to vector<8x8xf32>
      %13 = arith.mulf %11, %12 : vector<8x8xf32>
      %c0_11 = arith.constant 0 : index
      %c0_12 = arith.constant 0 : index
      %14 = vector.load %arg2[%c0_11, %c0_12] : memref<8x8xf32, #tpu.memory_space<vmem>>, vector<8x8xf32>
      tpu.vector_store %arg2[%c0_11, %c0_12], %13 {strides = array<i32>} : memref<8x8xf32, #tpu.memory_space<vmem>>, vector<8x8xf32>,
    } else {
    }
    return
  }
  func.func @transform_0(%arg0: i32) -> (i32, i32) {
    %c0_i32 = arith.constant 0 : i32
    %c0_i32_0 = arith.constant 0 : i32
    return %c0_i32, %arg0 : i32, i32
  }
  func.func @transform_1(%arg0: i32) -> (i32, i32) {
    %c0_i32 = arith.constant 0 : i32
    %c0_i32_0 = arith.constant 0 : i32
    %c0_i32_1 = arith.constant 0 : i32
    return %c0_i32, %c0_i32_0 : i32, i32
  }
}

</mosaic_0001>

<bundles_post_ra>
// kernel: tpu_custom_call.1
= control target key start
LH: loop header
LB: loop body
LE: loop exit
PB: predicated region body
PF: predicated region fallthrough
CT: control target
= control target key end

     0   :  { %6 = vsyncpa [#allocation3], 0  ;;  %s215_s0 = inlined_call_operand.hbm [shape: f32[8,256], index: 0, kind: input, shape index: {}]   ;;  %s216_s1 = inlined_call_operand.hbm [shape: f32[8,8], index: 1, kind: output, shape index: {}]  }
   0x1   :  { %7 = vsyncpa [#allocation4], 0  ;;  %s175_s6 = smov [#allocation2]   ;;  %s127_s10 = scalar_lea.hbm %s215_s0, 256 }
   0x2   :  { %s14_s7 = sshll.u32 %s175_s6, 4  ;;  %p128_p0 = scmp.ne.s32.totalorder %s215_s0, %s127_s10  ;;  %s15_s7 = int_to_ptr.vmem [resolvable:$true] %s14_s7 }
   0x3   :  { %p131_p1 = scmp.lt.u32.totalorder %s127_s10, %s215_s0 }
   0x5   :  { %p133_p2 = pnand %p131_p1, %p128_p0 }
   0x7   :  { %136 = shalt.err (!%p133_p2)
}
   0x8   :  { %s137_s15 = scalar_lea.vmem %s15_s7, 256  ;;  %p142_p4 = scmp.lt.s32.totalorder %s15_s7, %s15_s7 }
   0x9   :  { %p138_p3 = scmp.ne.s32.totalorder %s15_s7, %s137_s15  ;;  %p143_p5 = scmp.lt.s32.totalorder %s137_s15, %s137_s15 }
   0xb   :  { %p144_p6 = por %p143_p5, %p142_p4 }
   0xd   :  { %p145_p7 = pnand %p144_p6, %p138_p3 }
   0xf   :  { %148 = shalt.err (!%p145_p7)
}
  0x10   :  { %17 = dma.hbm_to_vmem [thread:$0]  %s215_s0, 256, %s15_s7, [#allocation3]  }
  0x11   :  { %171 = dma.done.wait [#allocation3], 256  }
  0x12   :  { %172 = vsyncadd [#allocation3], 4294967040  ;;  %vm25_vm0 = vcmask 64512   ;;  %v176_v0 = vmov 0.0   ;;  %v28_v1 = vld [vmem:[#allocation2 + $0x8] sm:$0xff]  ;;  %v27_v2 = vld [vmem:[#allocation2] sm:$0xff] }
  0x13   :  { %26 = vst.msk [vmem:[#allocation5] sm:$0xff] %vm25_vm0, %v176_v0  ;;  %30 = vmatprep.subr.mxu0 %v28_v1  ;;  %94 = vmatprep.mubr.f32.mxu0 %v28_v1  ;;  %s177_s18 = smov [#allocation5]  }
  0x14   :  { %31 = vmatpush1.xpose.msra.mxu0 %v27_v2  ;;  %s115_s0 = sshll.u32 %s177_s18, 4  ;;  %s116_s0 = int_to_ptr.vmem [resolvable:$true] %s115_s0 }
  0x15   :  { %s149_s19 = scalar_lea.vmem %s116_s0, 128  ;;  %p154_p9 = scmp.lt.s32.totalorder %s116_s0, %s116_s0 }
  0x16   :  { %p150_p8 = scmp.ne.s32.totalorder %s116_s0, %s149_s19  ;;  %p155_p10 = scmp.lt.s32.totalorder %s149_s19, %s149_s19 }
  0x17   :  { %95 = vmatmul.mubr.f32.vlgmr.msra.gmra.mrb[0].mxu0 %v27_v2 }
  0x18   :  { %p156_p11 = por %p155_p10, %p154_p9 }
  0x1a   :  { %v29_v3 = vld [vmem:[#allocation5] sm:$0xff]  ;;  %p157_p12 = pnand %p156_p11, %p150_p8 }
  0xea   :  { %v96_v4 = vpop.f32.mrb[0].mxu0 }
  0xeb   :  { %v100_v5 = vadd.f32 %v96_v4, %v29_v3  ;;  %v98_v6 = vpop.f32.mrb[1].mxu0 }
  0xed   :  { %102 = vst.msk [vmem:[#allocation5] sm:$0xff] %vm25_vm0, %v100_v5 }
  0xf4   :  { %v106_v7 = vld [vmem:[#allocation5] sm:$0xff] }
  0xf5   :  { %v107_v8 = vmul.f32 0.00048828125, %v106_v7 }
  0xf7   :  { %108 = vst.msk [vmem:[#allocation5] sm:$0xff] %vm25_vm0, %v107_v8 }
  0xf8   :  { %160 = shalt.err (!%p157_p12)
}
  0xf9   :  { %s161_s22 = scalar_lea.hbm %s216_s1, 128 }
  0xfa   :  { %p162_p13 = scmp.ne.s32.totalorder %s216_s1, %s161_s22  ;;  %p165_p0 = scmp.lt.u32.totalorder %s161_s22, %s216_s1 }
  0xfc   :  { %p167_p1 = pnand %p165_p0, %p162_p13 }
  0xfe   :  { %170 = shalt.err (!%p167_p1)
}
  0xff   :  { %118 = dma.vmem_to_hbm [thread:$0]  %s116_s0, 128, %s216_s1, [#allocation4]  }
 0x100   :  { %173 = dma.done.wait [#allocation4], 128  }
 0x101   :  { %174 = vsyncadd [#allocation4], 4294967168 }
 0x102   :  { %122 = vsyncpa [#allocation3], 1 }
 0x103   :  { %123 = vsyncpa [#allocation4], 1 }

</bundles_post_ra>
